<compile_context>
chip_gen: v6e
topology: v6e:2x2x1
jax: 0.10.0
libtpu: 0.0.40
codegen_flags: <defaults>
</compile_context>

<pallas_src>
import functools

import jax
import jax.numpy as jnp
from jax.experimental import pallas as pl
from jax.experimental.pallas import tpu as pltpu


def _round_up(x, m):
    return ((x + m - 1) // m) * m


def _vmem_capacity_bytes(default=64 * 1024 * 1024):
    """Physical VMEM per TensorCore (128 MiB on v5e/v6e, 64 MiB on v7x)."""
    try:
        info = pltpu.get_tpu_info()
        return int(getattr(info, "vmem_capacity_bytes", default))
    except Exception:
        return default


def _layernorm_kernel(x_ref, g_ref, b_ref, o_ref, *, eps, valid_dim):
    # x_ref: (tile_rows, dim_p), g_ref / b_ref: (1, dim_p)
    x = x_ref[...].astype(jnp.float32)
    block_dim = x.shape[-1]
    inv_n = 1.0 / float(valid_dim)
    if valid_dim == block_dim:
        mean = jnp.sum(x, axis=-1, keepdims=True) * inv_n
        centered = x - mean
    else:
        # Feature axis was zero-padded to a lane-dense multiple of 128;
        # mask the pad lanes out of the mean/variance reductions.
        lane = jax.lax.broadcasted_iota(jnp.int32, x.shape, dimension=x.ndim - 1)
        valid = lane < valid_dim
        mean = jnp.sum(jnp.where(valid, x, 0.0), axis=-1, keepdims=True) * inv_n
        centered = jnp.where(valid, x - mean, 0.0)
    var = jnp.sum(centered * centered, axis=-1, keepdims=True) * inv_n
    inv = jax.lax.rsqrt(var + eps)
    y = centered * inv * g_ref[...].astype(jnp.float32) + b_ref[...].astype(jnp.float32)
    o_ref[...] = y.astype(o_ref.dtype)


def layernorm_pallas(x2d, gamma, beta, *, eps=1e-5, tile_rows=None):
    """LayerNorm over the last axis of a 2-D array (rows, dim)."""
    rows, dim = x2d.shape
    itemsize = jnp.dtype(x2d.dtype).itemsize
    # Sublane packing: 8 rows/vreg at 32-bit, 16 at bf16, 32 at 8-bit dtypes.
    row_align = max(8, 32 // max(1, itemsize))

    # Lane-dense feature axis (multiple of 128) -> unmasked full-width stores.
    dim_p = dim if dim % 128 == 0 else _round_up(dim, 128)

    vmem_phys = _vmem_capacity_bytes()
    # Per-generation block target: ~8 MiB on v5e/v6e (128 MiB VMEM), ~4 MiB on
    # v7x (64 MiB VMEM).  Size off the f32 working set since the kernel
    # upcasts to f32 for mean/var.
    target_block_bytes = min(8 << 20, max(1 << 20, vmem_phys // 16))
    bytes_per_row = dim_p * max(itemsize, 4)

    if tile_rows is None:
        tile_rows = max(
            row_align,
            (target_block_bytes // bytes_per_row) // row_align * row_align,
        )
        # Keep >= 2 grid steps when possible so megacore (v7x: 2 TCs/chip) has
        # work on both cores instead of collapsing to a single serial step.
        half_rows = _round_up(max(pl.cdiv(rows, 2), 1), row_align)
        tile_rows = min(tile_rows, half_rows)
    else:
        tile_rows = _round_up(max(int(tile_rows), 1), row_align)

    rows_p = _round_up(rows, tile_rows)

    # Pad ragged rows / feature axis instead of asserting divisibility.
    if rows_p != rows or dim_p != dim:
        x2d = jnp.pad(x2d, ((0, rows_p - rows), (0, dim_p - dim)))
    if dim_p != dim:
        gamma = jnp.pad(gamma, ((0, 0), (0, dim_p - dim)))
        beta = jnp.pad(beta, ((0, 0), (0, dim_p - dim)))

    grid = (rows_p // tile_rows,)

    # Explicit scoped-VMEM budget: double-buffered in/out tiles plus the f32
    # working set, with headroom.  Lifts v5e's 16 MiB default scoped limit and
    # stays comfortably under v7x's 64 MiB physical VMEM.
    io_block = tile_rows * dim_p * itemsize
    f32_block = tile_rows * dim_p * 4
    needed = 4 * io_block + 4 * f32_block + (4 << 20)
    vmem_limit = int(min(max(needed, 32 << 20), int(vmem_phys * 0.75)))

    kernel = functools.partial(_layernorm_kernel, eps=eps, valid_dim=dim)
    out = pl.pallas_call(
        kernel,
        out_shape=jax.ShapeDtypeStruct((rows_p, dim_p), x2d.dtype),
        grid_spec=pltpu.PrefetchScalarGridSpec(
            num_scalar_prefetch=0,
            grid=grid,
            in_specs=[
                pl.BlockSpec((tile_rows, dim_p), lambda i: (i, 0)),
                pl.BlockSpec((1, dim_p), lambda i: (0, 0)),
                pl.BlockSpec((1, dim_p), lambda i: (0, 0)),
            ],
            out_specs=pl.BlockSpec((tile_rows, dim_p), lambda i: (i, 0)),
        ),
        compiler_params=pltpu.CompilerParams(
            dimension_semantics=("parallel",),
            vmem_limit_bytes=vmem_limit,
        ),
    )(x2d, gamma, beta)

    if rows_p != rows or dim_p != dim:
        out = out[:rows, :dim]
    return out


class PreNormPallas:
    """JAX/Pallas equivalent of the PyTorch PreNorm module."""

    def __init__(self, dim, fn):
        self.dim = dim
        self.fn = fn
        # nn.LayerNorm default init: weight = ones, bias = zeros, eps = 1e-5.
        self.gamma = jnp.ones((1, dim), dtype=jnp.float32)
        self.beta = jnp.zeros((1, dim), dtype=jnp.float32)
        self.eps = 1e-5

    def __call__(self, x, **kwargs):
        # x: (..., dim)
        orig_shape = x.shape
        x2d = x.reshape(-1, self.dim)
        y2d = layernorm_pallas(x2d, self.gamma, self.beta, eps=self.eps)
        y = y2d.reshape(orig_shape)
        # TODO(synk): when `fn` starts with a projection, fuse this LayerNorm as
        # the prologue of that matmul kernel to avoid the HBM round-trip of y.
        return self.fn(y, **kwargs)


if __name__ == "__main__":
    # Small deterministic example: batch=2, seq=8, dim=32.
    B, S, D = 2, 8, 32
    key = jax.random.PRNGKey(0)
    x = jax.random.normal(key, (B, S, D), dtype=jnp.float32)

    # fn is the arbitrary wrapped module in the original code; identity here.
    module = PreNormPallas(D, fn=lambda t: t)

    out = module(x)
    jax.block_until_ready(out)

    # Sanity check against a pure-JAX LayerNorm reference (gamma=1, beta=0).
    mean = jnp.mean(x, axis=-1, keepdims=True)
    var = jnp.mean((x - mean) ** 2, axis=-1, keepdims=True)
    ref = (x - mean) * jax.lax.rsqrt(var + 1e-5)
    assert out.shape == (B, S, D)
    assert jnp.max(jnp.abs(out - ref)) < 1e-5

    print("KERNEL_OK")
</pallas_src>

<mosaic_0001>
module attributes {stable_mosaic.version = 11 : i64} {
  func.func @_layernorm_kernel(%arg0: i32, %arg1: memref<8x128xf32, #tpu.memory_space<vmem>>, %arg2: memref<1x128xf32, #tpu.memory_space<vmem>>, %arg3: memref<1x128xf32, #tpu.memory_space<vmem>>, %arg4: memref<8x128xf32, #tpu.memory_space<vmem>>) attributes {dimension_semantics = [#tpu.dimension_semantics<parallel>], iteration_bounds = array<i64: 2>, scalar_prefetch = 0 : i64, scratch_operands = 0 : i64, tpu.core_type = #tpu.core_type<tc>, window_params = [{transform_indices = @transform_0, window_bounds = array<i64: 8, 128>}, {pipeline_mode = #tpu.pipeline_mode<synchronous>, transform_indices = @transform_1, window_bounds = array<i64: 1, 128>}, {pipeline_mode = #tpu.pipeline_mode<synchronous>, transform_indices = @transform_2, window_bounds = array<i64: 1, 128>}, {transform_indices = @transform_3, window_bounds = array<i64: 8, 128>}]} {
    %c0 = arith.constant 0 : index
    %c0_0 = arith.constant 0 : index
    %0 = vector.load %arg1[%c0, %c0_0] : memref<8x128xf32, #tpu.memory_space<vmem>>, vector<8x128xf32>
    %1 = tpu.iota {dimensions = array<i32: 1>} : vector<8x128xi32>
    %c32_i32 = arith.constant 32 : i32
    %2 = vector.broadcast %c32_i32 : i32 to vector<8x128xi32>
    %3 = arith.cmpi slt, %1, %2 : vector<8x128xi32>
    %cst = arith.constant 0.000000e+00 : f32
    %4 = vector.broadcast %cst : f32 to vector<8x128xf32>
    %5 = arith.select %3, %0, %4 : vector<8x128xi1>, vector<8x128xf32>
    %cst_1 = arith.constant dense<0.000000e+00> : vector<8xf32>
    %6 = vector.multi_reduction <add>, %5, %cst_1 [1] : vector<8x128xf32> to vector<8xf32>
    %7 = vector.shape_cast %6 : vector<8xf32> to vector<8x1xf32>
    %cst_2 = arith.constant 3.125000e-02 : f32
    %8 = vector.broadcast %cst_2 : f32 to vector<8x1xf32>
    %9 = arith.mulf %7, %8 : vector<8x1xf32>
    %10 = vector.broadcast %9 : vector<8x1xf32> to vector<8x128xf32>
    %11 = arith.subf %0, %10 : vector<8x128xf32>
    %cst_3 = arith.constant 0.000000e+00 : f32
    %12 = vector.broadcast %cst_3 : f32 to vector<8x128xf32>
    %13 = arith.select %3, %11, %12 : vector<8x128xi1>, vector<8x128xf32>
    %14 = arith.mulf %13, %13 : vector<8x128xf32>
    %cst_4 = arith.constant dense<0.000000e+00> : vector<8xf32>
    %15 = vector.multi_reduction <add>, %14, %cst_4 [1] : vector<8x128xf32> to vector<8xf32>
    %16 = vector.shape_cast %15 : vector<8xf32> to vector<8x1xf32>
    %cst_5 = arith.constant 3.125000e-02 : f32
    %17 = vector.broadcast %cst_5 : f32 to vector<8x1xf32>
    %18 = arith.mulf %16, %17 : vector<8x1xf32>
    %cst_6 = arith.constant 9.99999974E-6 : f32
    %19 = vector.broadcast %cst_6 : f32 to vector<8x1xf32>
    %20 = arith.addf %18, %19 : vector<8x1xf32>
    %21 = math.rsqrt %20 : vector<8x1xf32>
    %22 = vector.broadcast %21 : vector<8x1xf32> to vector<8x128xf32>
    %23 = arith.mulf %13, %22 : vector<8x128xf32>
    %c0_7 = arith.constant 0 : index
    %c0_8 = arith.constant 0 : index
    %24 = vector.load %arg2[%c0_7, %c0_8] : memref<1x128xf32, #tpu.memory_space<vmem>>, vector<1x128xf32>
    %25 = vector.broadcast %24 : vector<1x128xf32> to vector<8x128xf32>
    %26 = arith.mulf %23, %25 : vector<8x128xf32>
    %c0_9 = arith.constant 0 : index
    %c0_10 = arith.constant 0 : index
    %27 = vector.load %arg3[%c0_9, %c0_10] : memref<1x128xf32, #tpu.memory_space<vmem>>, vector<1x128xf32>
    %28 = vector.broadcast %27 : vector<1x128xf32> to vector<8x128xf32>
    %29 = arith.addf %26, %28 : vector<8x128xf32>
    %c0_11 = arith.constant 0 : index
    %c0_12 = arith.constant 0 : index
    %30 = vector.load %arg4[%c0_11, %c0_12] : memref<8x128xf32, #tpu.memory_space<vmem>>, vector<8x128xf32>
    tpu.vector_store %arg4[%c0_11, %c0_12], %29 {strides = array<i32>} : memref<8x128xf32, #tpu.memory_space<vmem>>, vector<8x128xf32>,
    return
  }
  func.func @transform_0(%arg0: i32) -> (i32, i32) {
    %c0_i32 = arith.constant 0 : i32
    %c0_i32_0 = arith.constant 0 : i32
    return %arg0, %c0_i32 : i32, i32
  }
  func.func @transform_1(%arg0: i32) -> (i32, i32) {
    %c0_i32 = arith.constant 0 : i32
    %c0_i32_0 = arith.constant 0 : i32
    %c0_i32_1 = arith.constant 0 : i32
    return %c0_i32, %c0_i32_0 : i32, i32
  }
  func.func @transform_2(%arg0: i32) -> (i32, i32) {
    %c0_i32 = arith.constant 0 : i32
    %c0_i32_0 = arith.constant 0 : i32
    %c0_i32_1 = arith.constant 0 : i32
    return %c0_i32, %c0_i32_0 : i32, i32
  }
  func.func @transform_3(%arg0: i32) -> (i32, i32) {
    %c0_i32 = arith.constant 0 : i32
    %c0_i32_0 = arith.constant 0 : i32
    return %arg0, %c0_i32 : i32, i32
  }
}

</mosaic_0001>

<bundles_post_ra>
// kernel: tpu_custom_call.1
= control target key start
LH: loop header
LB: loop body
LE: loop exit
PB: predicated region body
PF: predicated region fallthrough
CT: control target
= control target key end

     0   :  { %8 = vsyncpa [#allocation3], 0  ;;  %s629_s0 = inlined_call_operand.hbm [shape: f32[16,128], index: 0, kind: input, shape index: {}]   ;;  %s630_s1 = inlined_call_operand.vmem [shape: f32[1,128], index: 1, kind: input, shape index: {}]   ;;  %s631_s2 = inlined_call_operand.vmem [shape: f32[1,128], index: 2, kind: input, shape index: {}]   ;;  %s632_s3 = inlined_call_operand.hbm [shape: f32[16,128], index: 3, kind: output, shape index: {}]  }
   0x1   :  { %10 = vsyncpa [#allocation3 + $0x1], 0 }
   0x2   :  { %11 = vsyncpa [#allocation4], 0 }
   0x3   :  { %13 = vsyncpa [#allocation4 + $0x1], 0  ;;  %s482_s12 = smov 0   ;;  %s484_s13 = smov 0  }
   0x4   :  { %s486_s14 = smov 0   ;;  %s488_s15 = smov 0  }
   0x5 LB: > { %s503_s16 = sadd.s32 4294967295, %s458_s15   ;;  %s304_s17 = sadd.s32 4294967294, %s458_s15   ;;  %s458_s15 = sphi %s488_s15, %s649_s15   ;;  %s454_s14 = sphi %s486_s14, %s648_s14   ;;  %s450_s13 = sphi %s484_s13, %s647_s13   ;;  %s446_s12 = sphi %s482_s12, %s646_s12  }
   0x6   : > { %s507_s18 = sadd.s32 1, %s458_s15   ;;  %s26_s19 = sadd.s32 1, %s454_s14 }
   0x7   : > { %s23_s20 = ssub.s32 %s458_s15, %s507_s18  ;;  %p33_p0 = scmp.ne.s32.totalorder %s454_s14, %s450_s13 }
   0x8   : > { %p24_p1 = scmp.eq.s32.totalorder %s23_s20, 0  ;;  %p34_p2 = scmp.eq.s32.totalorder %s458_s15, 0 }
   0x9   : > { %p39_p3 = scmp.ne.s32.totalorder %s450_s13, %s446_s12  ;;  %p40_p4 = scmp.eq.s32.totalorder %s503_s16, 0 }
   0xa   : > { %s519_s21 = scalar_select %p24_p1, %s454_s14, %s26_s19  }
   0xb   : > { %p521_p5 = por %p34_p2, %p33_p0  ;;  %p525_p6 = por %p40_p4, %p39_p3 }
   0xc   : > { %p105_p7 = scmp.eq.s32.totalorder %s503_s16, 1  ;;  %p111_p8 = scmp.eq.s32.totalorder %s304_s17, 1 }
   0xd   : > { %s636_s23 = scalar_select %p525_p6, 1, 0 }
   0xe   : > { %p330_p10 = scmp.lt.s32.totalorder %s458_s15, 2  ;;  %p532_p11 = por %p105_p7, %p33_p0 }
   0xf   : > { %p536_p12 = por %p111_p8, %p39_p3  ;;  %s137_s26 = sand.u32 1, %s454_s14  }
  0x10   : > { %s637_s24 = scalar_select %p532_p11, 1, 0 }
  0x11   : > { %s638_s25 = scalar_select %p536_p12, 1, 0 }
  0x12   : > { %s308_s27 = sshll.u32 %s458_s15, 7  ;;  %s307_s28 = sshll.u32 %s137_s26, 3 }
  0x13   : > { %s545_s4 = scalar_lea.hbm %s629_s0, %s308_s27  ;;  %s141_s5 = scalar_lea.vmem [#allocation2], %s307_s28 }
  0x14   : > { %s148_s6 = sshll.u32 %s141_s5, 4  ;;  %p549_p13 = pnand %p330_p10, %p521_p5  ;;  %s553_s6 = int_to_ptr.vmem [resolvable:$true] %s148_s6 }
  0x15   : > { %s138_s8 = scalar_lea.sflag [#allocation3], %s137_s26  ;;  %s366_s9 = scalar_lea.hbm %s545_s4, 128 }
  0x16   : > { %p367_p2 = scmp.ne.s32.totalorder %s545_s4, %s366_s9  ;;  %p368_p3 = pneg %p549_p13 }
  0x17   : > { %s371_s17 = scalar_lea.hbm %s629_s0, 256  ;;  %p372_p5 = scmp.lt.s32.totalorder %s545_s4, %s629_s0 }
  0x18   : > { %p369_p4 = pnand %p368_p3, %p367_p2  ;;  %p373_p8 = scmp.lt.s32.totalorder %s371_s17, %s366_s9 }
  0x1a   : > { %p370_p7 = pneg %p369_p4  ;;  %p374_p10 = por %p373_p8, %p372_p5 }
  0x1c   : > { %p375_p9 = pnand %p374_p10, %p370_p7 }
  0x1e   : > { %378 = shalt.err (!%p375_p9)
}
  0x1f   : > { %s379_s22 = scalar_lea.vmem %s553_s6, 128  ;;  %s460_s26 = smov [#allocation2]  }
  0x20   : > { %p380_p0 = scmp.ne.s32.totalorder %s553_s6, %s379_s22  ;;  %s384_s27 = sshll.u32 %s460_s26, 4  ;;  %s385_s27 = int_to_ptr.vmem [resolvable:$false] %s384_s27 }
  0x21   : > { %s386_s28 = scalar_lea.vmem %s385_s27, 256  ;;  %p387_p4 = scmp.lt.s32.totalorder %s553_s6, %s385_s27 }
  0x22   : > { %p382_p1 = pnand %p380_p0, %p368_p3  ;;  %p388_p12 = scmp.lt.s32.totalorder %s386_s28, %s379_s22 }
  0x24   : > { %p383_p2 = pneg %p382_p1  ;;  %p389_p11 = por %p388_p12, %p387_p4 }
  0x26   : > { %p390_p6 = pnand %p389_p11, %p383_p2 }
  0x28   : > { %393 = shalt.err (!%p390_p6)
}
  0x29   : > { %325 = dma.hbm_to_vmem [thread:$0]  (!%p549_p13), %s545_s4, 128, %s553_s6, %s138_s8  }
  0x2a   : > { %p640_p9 = scmp.lt.s32.totalorder %s458_s15, 3  ;;  %p641_p7 = scmp.ge.s32.totalorder %s458_s15, 1 }
  0x2c   : > { %p154_p0 = pnand %p641_p7, %p640_p9 }
  0x2d   : > { %s580_s29 = sand.u32 (!%p154_p0), 1, %s450_s13   ;;  %p642_p6 = scmp.ne.s32.totalorder (!%p154_p0), %s636_s23, 0 }
  0x2e   : > { %157 = sbr.rel (%p154_p0) target bundleno = 378 (0x17a), region = 32  ;;  %s310_s30 = sshll.u32 (!%p154_p0), %s580_s29, 3 }
  0x2f   : > { %s160_s5 = scalar_lea.sflag (!%p154_p0), [#allocation3], %s580_s29  ;;  %s163_s9 = scalar_lea.vmem (!%p154_p0), [#allocation2], %s310_s30 }
  0x33   : > { %437 = dma.done.wait (%p642_p6), %s160_s5, 128  }
  0x34   : > { %439 = vsyncadd (%p642_p6), %s160_s5, 4294967168  ;;  %v187_v0 = vlaneseq  ;;  %v186_v2 = vld [vmem:[%s163_s9] sm:$0xff]  ;;  %s315_s8 = sshll.u32 %s503_s16, 7  ;;  %s185_s10 = scalar_lea.vmem [#allocation5], %s310_s30 }
  0x35   : > { %v312_v13 = vld [vmem:[%s630_s1] ss:$0 sm:$0xff]  ;;  %s234_s11 = sshll.u32 %s185_s10, 4  ;;  %s232_s20 = scalar_lea.hbm %s632_s3, %s315_s8  ;;  %s235_s11 = int_to_ptr.vmem [resolvable:$true] %s234_s11 }
  0x36   : > { %v188_v1 = vand.u32 127, %v187_v0  ;;  %v313_v15 = vld [vmem:[%s631_s2] ss:$0 sm:$0xff]  ;;  %s221_s22 = scalar_lea.sflag [#allocation4], %s580_s29  ;;  %s394_s26 = scalar_lea.vmem %s235_s11, 128 }
  0x37   : > { %p395_p11 = scmp.ne.s32.totalorder %s235_s11, %s394_s26  ;;  %p643_p12 = scmp.ne.s32.totalorder %s637_s24, 0 }
  0x38   : > { %vm189_vm0 = vcmp.lt.s32.totalorder %v188_v1, 32  ;;  %s461_s27 = smov [#allocation5]  }
  0x39   : > { %v190_v3 = vsel %vm189_vm0, %v186_v2, 0.0  ;;  %p396_p13 = pnand %p395_p11, %p643_p12  ;;  %s398_s28 = sshll.u32 %s461_s27, 4  ;;  %s399_s28 = int_to_ptr.vmem [resolvable:$false] %s398_s28 }
  0x3a   : > { %191 = vadd.xlane.f32.xlu0 %v190_v3  ;;  %s400_s16 = scalar_lea.vmem %s399_s28, 256  ;;  %p401_p3 = scmp.lt.s32.totalorder %s235_s11, %s399_s28 }
  0x3b   : > { %p397_p1 = pneg %p396_p13  ;;  %p402_p5 = scmp.lt.s32.totalorder %s400_s16, %s394_s26 }
  0x3d   : > { %p403_p8 = por %p402_p5, %p401_p3 }
  0x3f   : > { %p404_p10 = pnand %p403_p8, %p397_p1 }
  0xc3   : > { %v192_v4 = vpop.xlane.xlu0 %191 }
  0xc4   : > { %v193_v5 = vmul.f32 0.03125, %v192_v4 }
  0xc6   : > { %v194_v6 = vsub.f32 %v186_v2, %v193_v5 }
  0xc8   : > { %v195_v7 = vsel %vm189_vm0, %v194_v6, 0.0 }
  0xc9   : > { %v196_v8 = vmul.f32 %v195_v7, %v195_v7 }
  0xcb   : > { %197 = vadd.xlane.f32.xlu0 %v196_v8 }
 0x154   : > { %v198_v9 = vpop.xlane.xlu0 %197 }
 0x155   : > { %v199_v10 = vmul.f32 0.03125, %v198_v9 }
 0x157   : > { %v200_v11 = vadd.f32 1e-05, %v199_v10 }
 0x159   : > { %364 = vrsqrt.f32 %v200_v11 }
 0x166   : > { %v365_v12 = vpop.eup %364 }
 0x167   : > { %v202_v14 = vmul.f32 %v365_v12, %v195_v7 }
 0x169   : > { %v210_v16 = vmul.f32 %v312_v13, %v202_v14 }
 0x16b   : > { %v218_v17 = vadd.f32 %v313_v15, %v210_v16 }
 0x16d   : > { %219 = vst [vmem:[%s185_s10] sm:$0xff] %v218_v17 }
 0x16e   : > { %407 = shalt.err (!%p404_p10)
}
 0x16f   : > { %s408_s30 = scalar_lea.hbm %s232_s20, 128  ;;  %s412_s9 = scalar_lea.hbm %s632_s3, 256 }
 0x170   : > { %p409_p2 = scmp.ne.s32.totalorder %s232_s20, %s408_s30  ;;  %p413_p7 = scmp.lt.s32.totalorder %s232_s20, %s632_s3 }
 0x171   : > { %p414_p0 = scmp.lt.s32.totalorder %s412_s9, %s408_s30 }
 0x172   : > { %p410_p4 = pnand %p409_p2, %p643_p12 }
 0x173   : > { %p415_p6 = por %p414_p0, %p413_p7 }
 0x174   : > { %p411_p9 = pneg %p410_p4 }
 0x176   : > { %p416_p11 = pnand %p415_p6, %p411_p9 }
 0x178   : > { %419 = shalt.err (!%p416_p11)
}
 0x179   : > { %320 = dma.vmem_to_hbm [thread:$0]  (%p643_p12), %s235_s11, 128, %s232_s20, %s221_s22  }
 0x17a PF: > { %s246_s6 = sand.u32 1, %s446_s12   ;;  %p644_p13 = scmp.ne.s32.totalorder %s638_s25, 0 }
 0x17b   : > { %p645_p1 = scmp.ge.s32.totalorder %s458_s15, 2  ;;  %s247_s7 = scalar_lea.sflag [#allocation4], %s246_s6 }
 0x17d   : > { %p327_p3 = pnand %p645_p1, %p644_p13 }
 0x17f   : > { %p328_p5 = pneg %p327_p3 }
 0x181   : > { %441 = dma.done.wait (%p328_p5), %s247_s7, 128  }
 0x182   : > { %443 = vsyncadd (%p328_p5), %s247_s7, 4294967168  ;;  %p16_p8 = scmp.ge.s32.totalorder %s507_s18, 4   ;;  %s646_s12 = smov %s450_s13 }
 0x183   : > { %s647_s13 = smov %s454_s14  ;;  %s648_s14 = smov %s519_s21 }
 0x184   : > { %s649_s15 = smov %s507_s18  ;;  %18 = sbr.rel (!%p16_p8) target bundleno = 5 (0x5), region = 77 }
 0x189   :  { %252 = vsyncpa [#allocation3], 1 }
 0x18a   :  { %254 = vsyncpa [#allocation3 + $0x1], 1 }
 0x18b   :  { %255 = vsyncpa [#allocation4], 1 }
 0x18c   :  { %257 = vsyncpa [#allocation4 + $0x1], 1 }

</bundles_post_ra>
